<compile_context>
chip_gen: v5e
topology: v5e:2x2
jax: 0.10.0
libtpu: 0.0.40
codegen_flags: <defaults>
</compile_context>

<pallas_src>
import functools

import jax
import jax.numpy as jnp
from jax.experimental import pallas as pl
from jax.experimental.pallas import tpu as pltpu

_MIB = 1024 * 1024


# --------------------------------------------------------------------------
# Kernel bodies
# --------------------------------------------------------------------------
def _row_loss_and_valid(y_pred_ref, y_true_ref, *, ignore_index, n_rows,
                        bf16_exp):
    """Per-row dice loss (TN,1 f32, masked to 0) and validity mask (TN,1 bool)."""
    x = y_pred_ref[...]                              # (TN, C) native dtype
    labels = y_true_ref[...]                         # (TN, 1) int32
    tn = x.shape[0]

    # Row max and one-hot "gather" on the native-dtype tile.  Both are exact
    # in bf16 (max is order-only; the where+sum touches a single nonzero per
    # row), and bf16 VPU/XLU ops are 2x-packed on v6e/v7x, so this removes a
    # full-width f32 where+add chain and a f32 max-reduce vs. upcasting first.
    class_ids = jax.lax.broadcasted_iota(jnp.int32, x.shape, 1)
    m = jnp.max(x, axis=-1, keepdims=True)                            # (TN,1)
    x_true = jnp.sum(jnp.where(class_ids == labels, x, jnp.zeros_like(x)),
                     axis=-1, keepdims=True)                          # (TN,1)

    m_f = m.astype(jnp.float32)
    shifted = x.astype(jnp.float32) - m_f                             # (TN,C)
    if bf16_exp:
        # Flag-guarded fast path: EUP exp in bf16 (~2x exp throughput on
        # v6e/v7x); slight deviation from the f32 reference numerics.
        e = jnp.exp(shifted.astype(jnp.bfloat16)).astype(jnp.float32)
    else:
        e = jnp.exp(shifted)                                          # (TN,C)
    s = jnp.sum(e, axis=-1, keepdims=True)                            # (TN,1)
    e_true = jnp.exp(x_true.astype(jnp.float32) - m_f)                # (TN,1)
    p = e_true / s                                                    # (TN,1)

    # loss = 1 - 2*(1-p)*p / ((1-p)*p + 1)
    q = (1.0 - p) * p
    loss = 1.0 - 2.0 * q / (q + 1.0)                                  # (TN,1)

    # Mask ignored labels and rows past the logical end (ragged last block).
    # NOTE: must stay a select (jnp.where), not multiply-by-mask — padded rows
    # can hold NaN/Inf that a multiply would propagate.
    row_ids = (pl.program_id(0) * tn
               + jax.lax.broadcasted_iota(jnp.int32, (tn, 1), 0))
    valid = (labels != ignore_index) & (row_ids < n_rows)             # (TN,1)
    loss = jnp.where(valid, loss, 0.0)
    return loss, valid


def _dsc_rows_lane_kernel(y_pred_ref, y_true_ref, loss_ref, *,
                          ignore_index, n_rows, bf16_exp):
    """reduction='none', lane-dense (1, 1, block_n) output block."""
    loss, _ = _row_loss_and_valid(y_pred_ref, y_true_ref,
                                  ignore_index=ignore_index, n_rows=n_rows,
                                  bf16_exp=bf16_exp)
    # Column (TN,1) -> row (1,TN) relayout so the writeback is an unmasked
    # dense vst + contiguous DMA instead of 1-lane masked strided stores.
    loss_ref[...] = jnp.expand_dims(pltpu.einshape("ab->ba", loss), 0)


def _dsc_rows_col_kernel(y_pred_ref, y_true_ref, loss_ref, *,
                         ignore_index, n_rows, bf16_exp):
    """reduction='none', (block_n, 1) column output — lowering-safe fallback."""
    loss, _ = _row_loss_and_valid(y_pred_ref, y_true_ref,
                                  ignore_index=ignore_index, n_rows=n_rows,
                                  bf16_exp=bf16_exp)
    loss_ref[...] = loss


def _dsc_reduce_kernel(y_pred_ref, y_true_ref, partial_ref, *,
                       ignore_index, n_rows, bf16_exp):
    """reduction='mean'/'sum': one lane-dense (1,1,128) partial block per step.

    lane 0 = sum of masked loss over this block, lane 1 = valid-label count.
    """
    loss, valid = _row_loss_and_valid(y_pred_ref, y_true_ref,
                                      ignore_index=ignore_index, n_rows=n_rows,
                                      bf16_exp=bf16_exp)
    block_sum = jnp.sum(loss)
    block_cnt = jnp.sum(valid.astype(jnp.float32))
    lane = jax.lax.broadcasted_iota(jnp.int32, partial_ref.shape, 2)
    partial_ref[...] = jnp.where(
        lane == 0, block_sum,
        jnp.where(lane == 1, block_cnt, jnp.float32(0.0)))


# --------------------------------------------------------------------------
# Sizing helpers
# --------------------------------------------------------------------------
def _pick_vmem_limit_bytes():
    """Generation-aware scoped-VMEM request: ~3/4 of physical, capped at 96 MiB.

    v5e/v6e (128 MiB physical) -> 96 MiB; v7x (64 MiB physical) -> 48 MiB.
    """
    try:
        phys = pltpu.get_tpu_info().vmem_capacity_bytes
    except Exception:
        phys = 64 * _MIB                     # assume the smallest (v7x-like)
    return int(min(96 * _MIB, phys * 3 // 4))


def _sublane_multiple(dtype):
    """Minimum sublane tile for the dtype: 8 (4-byte) / 16 (bf16) / 32 (int8/fp8)."""
    return max(8, 32 // jnp.dtype(dtype).itemsize)


def _choose_block_n(n_rows, n_classes, in_dtype, vmem_limit_bytes,
                    lane_dense_out):
    """Row-tile size derived from a real VMEM byte budget (25% headroom)."""
    sub = _sublane_multiple(in_dtype)
    c_pad = max(128, -(-n_classes // 128) * 128)      # lane padding in VMEM
    in_itemsize = jnp.dtype(in_dtype).itemsize
    # Per-row VMEM bytes:
    #   2 x bn x C_pad x itemsize   double-buffered native-dtype logits tile
    #   2 x bn x 512 B              double-buffered int32 label tile (lanes pad to 128)
    #   3 x bn x C_pad x 4 B        live f32 temporaries (upcast, shifted, e)
    #   output buffers              ~64 B/row lane-dense, ~1 KiB/row column
    out_bytes = 64 if lane_dense_out else 1024
    per_row = (2 * c_pad * in_itemsize
               + 2 * 128 * 4
               + 3 * c_pad * 4
               + out_bytes)
    budget = int(vmem_limit_bytes * 3 // 4)           # ~25% headroom
    bn = budget // per_row
    # Measured: ~512-row tiles already hit ~85% of HBM roofline; 2048 caps
    # the fully-unrolled vector-op count / compile time with no perf loss.
    bn = min(bn, 2048)
    # Keep at least two grid steps so the 'parallel' axis can be split across
    # the two v7x TensorCores and the software pipeline has >1 stage.
    half_rows = -(-n_rows // 2)
    bn = min(bn, -(-half_rows // sub) * sub)
    bn = max(sub, (bn // sub) * sub)                  # dtype sublane multiple
    return int(bn)


# --------------------------------------------------------------------------
# Public wrapper
# --------------------------------------------------------------------------
def dsc_loss(y_pred, y_true, *, reduction="mean", ignore_index=-100,
             block_n=None, use_bf16_exp=False):
    """Pallas implementation of DSCLoss.forward.

    y_pred: [..., C] float logits (any float dtype; kept native in HBM).
    y_true: [...] int labels.
    Note: reduction='mean' with zero valid labels returns NaN/Inf (division by
    a zero count), matching the PyTorch reference.
    """
    if reduction not in ("none", "mean", "sum"):
        raise ValueError(
            f"{reduction} is not allow, only permit `none` `mean` and `sum`. ")

    C = y_pred.shape[-1]
    y_pred2 = y_pred.reshape(-1, C)                  # native dtype, no HBM copy
    y_true2 = y_true.reshape(-1, 1).astype(jnp.int32)
    N = y_pred2.shape[0]

    vmem_limit = _pick_vmem_limit_bytes()
    lane_dense_none = reduction == "none"
    if block_n is None:
        block_n = _choose_block_n(N, C, y_pred2.dtype, vmem_limit,
                                  lane_dense_out=lane_dense_none)
    num_blocks = -(-N // block_n)
    grid = (num_blocks,)

    in_specs = [
        pl.BlockSpec((block_n, C), lambda i: (i, 0)),
        pl.BlockSpec((block_n, 1), lambda i: (i, 0)),
    ]
    cparams = pltpu.CompilerParams(
        dimension_semantics=("parallel",),   # no carried state -> v7x megacore OK
        vmem_limit_bytes=vmem_limit,
    )
    kw = dict(ignore_index=ignore_index, n_rows=N, bf16_exp=use_bf16_exp)

    if reduction == "none":
        # Lane-dense output slab, sliced back to the torch-shaped (N, 1) column
        # in the wrapper.  Guard: if this jax/Mosaic version cannot lower the
        # in-kernel column->lane relayout, fall back to the proven column
        # kernel (guard is effective in eager use; under an outer jit the
        # fallback would not trigger).
        try:
            lanes = pl.pallas_call(
                functools.partial(_dsc_rows_lane_kernel, **kw),
                out_shape=jax.ShapeDtypeStruct((num_blocks, 1, block_n),
                                               jnp.float32),
                grid_spec=pltpu.PrefetchScalarGridSpec(
                    num_scalar_prefetch=0,
                    grid=grid,
                    in_specs=in_specs,
                    out_specs=pl.BlockSpec((1, 1, block_n),
                                           lambda i: (i, 0, 0)),
                ),
                compiler_params=cparams,
            )(y_pred2, y_true2)
            return lanes.reshape(num_blocks * block_n, 1)[:N]
        except Exception:
            pass  # lowering guard only; the fallback below is always correct

        loss_rows = pl.pallas_call(
            functools.partial(_dsc_rows_col_kernel, **kw),
            out_shape=jax.ShapeDtypeStruct((N, 1), jnp.float32),
            grid_spec=pltpu.PrefetchScalarGridSpec(
                num_scalar_prefetch=0,
                grid=grid,
                in_specs=in_specs,
                out_specs=pl.BlockSpec((block_n, 1), lambda i: (i, 0)),
            ),
            compiler_params=cparams,
        )(y_pred2, y_true2)
        return loss_rows                             # [N, 1], like torch

    # mean / sum: reduction-only variant, no per-row output traffic.
    partials = pl.pallas_call(
        functools.partial(_dsc_reduce_kernel, **kw),
        out_shape=jax.ShapeDtypeStruct((num_blocks, 1, 128), jnp.float32),
        grid_spec=pltpu.PrefetchScalarGridSpec(
            num_scalar_prefetch=0,
            grid=grid,
            in_specs=in_specs,
            out_specs=pl.BlockSpec((1, 1, 128), lambda i: (i, 0, 0)),
        ),
        compiler_params=cparams,
    )(y_pred2, y_true2)

    loss_sum = jnp.sum(partials[:, 0, 0])
    if reduction == "sum":
        return loss_sum
    count = jnp.sum(partials[:, 0, 1])
    return loss_sum / count


# --------------------------------------------------------------------------
# Pure-JAX reference mirroring the PyTorch module
# --------------------------------------------------------------------------
def _dsc_loss_ref(y_pred, y_true, reduction="mean", ignore_index=-100):
    C = y_pred.shape[-1]
    logits = y_pred.reshape(-1, C).astype(jnp.float32)
    labels = y_true.reshape(-1).astype(jnp.int32)
    prob = jax.nn.softmax(logits, axis=-1)
    one_hot = (labels[:, None] == jnp.arange(C)[None, :]).astype(jnp.float32)
    p = jnp.sum(prob * one_hot, axis=-1, keepdims=True)
    loss = 1.0 - 2.0 * (1.0 - p) * p / ((1.0 - p) * p + 1.0)
    valid = (labels != ignore_index)[:, None]
    num_labels = valid.sum()
    loss = loss * valid
    if reduction == "none":
        return loss
    if reduction == "mean":
        return loss.sum() / num_labels
    return loss.sum()


if __name__ == "__main__":
    key = jax.random.PRNGKey(0)
    k1, k2, k3, k4 = jax.random.split(key, 4)

    # Small classification-shaped problem: batch=2 * seq=8 flattened, 4 classes.
    N, C = 16, 4
    y_pred = jax.random.normal(k1, (N, C), dtype=jnp.float32)
    y_true = jax.random.randint(k2, (N,), 0, C, dtype=jnp.int32)
    y_true = y_true.at[3].set(-100).at[11].set(-100)   # ignore_index rows

    for red in ("mean", "sum", "none"):
        out = jax.block_until_ready(dsc_loss(y_pred, y_true, reduction=red))
        ref = _dsc_loss_ref(y_pred, y_true, red)
        assert jnp.allclose(out, ref, atol=1e-5, rtol=1e-5), (red, out, ref)

    # Ragged multi-block case (N not a multiple of the row tile) + bf16 logits
    # (exercises the dtype-aware sublane rounding and native-dtype gather/max).
    N2, C2 = 300, 10
    y_pred2 = jax.random.normal(k3, (N2, C2), dtype=jnp.bfloat16)
    y_true2 = jax.random.randint(k4, (N2,), 0, C2, dtype=jnp.int32)
    y_true2 = y_true2.at[0].set(-100).at[123].set(-100).at[299].set(-100)

    for red in ("mean", "none"):
        out = jax.block_until_ready(dsc_loss(y_pred2, y_true2, reduction=red))
        ref = _dsc_loss_ref(y_pred2, y_true2, red)
        assert jnp.allclose(out, ref, atol=1e-5, rtol=1e-5), (red, out, ref)

    print("KERNEL_OK")
</pallas_src>

<mosaic_0001>
module attributes {stable_mosaic.version = 11 : i64} {
  func.func @_dsc_reduce_kernel(%arg0: i32, %arg1: memref<8x4xf32, #tpu.memory_space<vmem>>, %arg2: memref<8x1xi32, #tpu.memory_space<vmem>>, %arg3: memref<1x1x128xf32, #tpu.memory_space<vmem>>) attributes {dimension_semantics = [#tpu.dimension_semantics<parallel>], iteration_bounds = array<i64: 2>, scalar_prefetch = 0 : i64, scratch_operands = 0 : i64, tpu.core_type = #tpu.core_type<tc>, window_params = [{transform_indices = @transform_0, window_bounds = array<i64: 8, 4>}, {transform_indices = @transform_1, window_bounds = array<i64: 8, 1>}, {transform_indices = @transform_2, window_bounds = array<i64: 1, 1, 128>}]} {
    %c0 = arith.constant 0 : index
    %c0_0 = arith.constant 0 : index
    %0 = vector.load %arg1[%c0, %c0_0] : memref<8x4xf32, #tpu.memory_space<vmem>>, vector<8x4xf32>
    %c0_1 = arith.constant 0 : index
    %c0_2 = arith.constant 0 : index
    %1 = vector.load %arg2[%c0_1, %c0_2] : memref<8x1xi32, #tpu.memory_space<vmem>>, vector<8x1xi32>
    %2 = tpu.iota {dimensions = array<i32: 1>} : vector<8x4xi32>
    %cst = arith.constant dense<0xFF800000> : vector<8xf32>
    %3 = vector.multi_reduction <maximumf>, %0, %cst [1] : vector<8x4xf32> to vector<8xf32>
    %4 = vector.shape_cast %3 : vector<8xf32> to vector<8x1xf32>
    %5 = vector.broadcast %1 : vector<8x1xi32> to vector<8x4xi32>
    %6 = arith.cmpi eq, %2, %5 : vector<8x4xi32>
    %cst_3 = arith.constant 0.000000e+00 : f32
    %7 = vector.broadcast %cst_3 : f32 to vector<8x4xf32>
    %8 = arith.select %6, %0, %7 : vector<8x4xi1>, vector<8x4xf32>
    %cst_4 = arith.constant dense<0.000000e+00> : vector<8xf32>
    %9 = vector.multi_reduction <add>, %8, %cst_4 [1] : vector<8x4xf32> to vector<8xf32>
    %10 = vector.shape_cast %9 : vector<8xf32> to vector<8x1xf32>
    %11 = vector.broadcast %4 : vector<8x1xf32> to vector<8x4xf32>
    %12 = arith.subf %0, %11 : vector<8x4xf32>
    %13 = math.exp %12 : vector<8x4xf32>
    %cst_5 = arith.constant dense<0.000000e+00> : vector<8xf32>
    %14 = vector.multi_reduction <add>, %13, %cst_5 [1] : vector<8x4xf32> to vector<8xf32>
    %15 = vector.shape_cast %14 : vector<8xf32> to vector<8x1xf32>
    %16 = arith.subf %10, %4 : vector<8x1xf32>
    %17 = math.exp %16 : vector<8x1xf32>
    %18 = arith.divf %17, %15 : vector<8x1xf32>
    %cst_6 = arith.constant 1.000000e+00 : f32
    %19 = vector.broadcast %cst_6 : f32 to vector<8x1xf32>
    %20 = arith.subf %19, %18 : vector<8x1xf32>
    %21 = arith.mulf %20, %18 : vector<8x1xf32>
    %cst_7 = arith.constant 2.000000e+00 : f32
    %22 = vector.broadcast %cst_7 : f32 to vector<8x1xf32>
    %23 = arith.mulf %22, %21 : vector<8x1xf32>
    %cst_8 = arith.constant 1.000000e+00 : f32
    %24 = vector.broadcast %cst_8 : f32 to vector<8x1xf32>
    %25 = arith.addf %21, %24 : vector<8x1xf32>
    %26 = arith.divf %23, %25 : vector<8x1xf32>
    %cst_9 = arith.constant 1.000000e+00 : f32
    %27 = vector.broadcast %cst_9 : f32 to vector<8x1xf32>
    %28 = arith.subf %27, %26 : vector<8x1xf32>
    %c8_i32 = arith.constant 8 : i32
    %29 = arith.muli %arg0, %c8_i32 : i32
    %30 = tpu.iota {dimensions = array<i32: 0>} : vector<8x1xi32>
    %31 = vector.broadcast %29 : i32 to vector<8x1xi32>
    %32 = arith.addi %31, %30 : vector<8x1xi32>
    %c-100_i32 = arith.constant -100 : i32
    %33 = vector.broadcast %c-100_i32 : i32 to vector<8x1xi32>
    %34 = arith.cmpi ne, %1, %33 : vector<8x1xi32>
    %c16_i32 = arith.constant 16 : i32
    %35 = vector.broadcast %c16_i32 : i32 to vector<8x1xi32>
    %36 = arith.cmpi slt, %32, %35 : vector<8x1xi32>
    %37 = arith.andi %34, %36 : vector<8x1xi1>
    %cst_10 = arith.constant 0.000000e+00 : f32
    %38 = vector.broadcast %cst_10 : f32 to vector<8x1xf32>
    %39 = arith.select %37, %28, %38 : vector<8x1xi1>, vector<8x1xf32>
    %40 = vector.shape_cast %39 : vector<8x1xf32> to vector<1x8x1xf32>
    %cst_11 = arith.constant dense<0.000000e+00> : vector<1xf32>
    %41 = vector.multi_reduction <add>, %40, %cst_11 [1, 2] : vector<1x8x1xf32> to vector<1xf32>
    %42 = vector.shape_cast %41 : vector<1xf32> to vector<1x1x1xf32>
    %43 = vector.extract %42[0, 0, 0] : f32 from vector<1x1x1xf32>
    %44 = arith.extui %37 : vector<8x1xi1> to vector<8x1xi32>
    %45 = arith.sitofp %44 : vector<8x1xi32> to vector<8x1xf32>
    %46 = vector.shape_cast %45 : vector<8x1xf32> to vector<1x8x1xf32>
    %cst_12 = arith.constant dense<0.000000e+00> : vector<1xf32>
    %47 = vector.multi_reduction <add>, %46, %cst_12 [1, 2] : vector<1x8x1xf32> to vector<1xf32>
    %48 = vector.shape_cast %47 : vector<1xf32> to vector<1x1x1xf32>
    %49 = vector.extract %48[0, 0, 0] : f32 from vector<1x1x1xf32>
    %50 = tpu.iota {dimensions = array<i32: 2>} : vector<1x1x128xi32>
    %c0_i32 = arith.constant 0 : i32
    %51 = vector.broadcast %c0_i32 : i32 to vector<1x1x128xi32>
    %52 = arith.cmpi eq, %50, %51 : vector<1x1x128xi32>
    %c1_i32 = arith.constant 1 : i32
    %53 = vector.broadcast %c1_i32 : i32 to vector<1x1x128xi32>
    %54 = arith.cmpi eq, %50, %53 : vector<1x1x128xi32>
    %cst_13 = arith.constant 0.000000e+00 : f32
    %55 = vector.broadcast %49 : f32 to vector<1x1x128xf32>
    %56 = vector.broadcast %cst_13 : f32 to vector<1x1x128xf32>
    %57 = arith.select %54, %55, %56 : vector<1x1x128xi1>, vector<1x1x128xf32>
    %58 = vector.broadcast %43 : f32 to vector<1x1x128xf32>
    %59 = arith.select %52, %58, %57 : vector<1x1x128xi1>, vector<1x1x128xf32>
    %c0_14 = arith.constant 0 : index
    %c0_15 = arith.constant 0 : index
    %c0_16 = arith.constant 0 : index
    %60 = vector.load %arg3[%c0_14, %c0_15, %c0_16] : memref<1x1x128xf32, #tpu.memory_space<vmem>>, vector<1x1x128xf32>
    tpu.vector_store %arg3[%c0_14, %c0_15, %c0_16], %59 {strides = array<i32>} : memref<1x1x128xf32, #tpu.memory_space<vmem>>, vector<1x1x128xf32>,
    return
  }
  func.func @transform_0(%arg0: i32) -> (i32, i32) {
    %c0_i32 = arith.constant 0 : i32
    %c0_i32_0 = arith.constant 0 : i32
    return %arg0, %c0_i32 : i32, i32
  }
  func.func @transform_1(%arg0: i32) -> (i32, i32) {
    %c0_i32 = arith.constant 0 : i32
    %c0_i32_0 = arith.constant 0 : i32
    return %arg0, %c0_i32 : i32, i32
  }
  func.func @transform_2(%arg0: i32) -> (i32, i32, i32) {
    %c0_i32 = arith.constant 0 : i32
    %c0_i32_0 = arith.constant 0 : i32
    %c0_i32_1 = arith.constant 0 : i32
    return %arg0, %c0_i32, %c0_i32_0 : i32, i32, i32
  }
}

</mosaic_0001>

<bundles_post_ra>
// kernel: tpu_custom_call.1
= control target key start
LH: loop header
LB: loop body
LE: loop exit
PB: predicated region body
PF: predicated region fallthrough
CT: control target
= control target key end

     0   :  { %7 = vsyncpa [#allocation3], 0  ;;  %s580_s0 = inlined_call_operand.vmem [shape: f32[16,4], index: 0, kind: input, shape index: {}]   ;;  %s581_s1 = inlined_call_operand.vmem [shape: s32[16,1], index: 1, kind: input, shape index: {}]   ;;  %s582_s2 = inlined_call_operand.hbm [shape: f32[2,1,128], index: 2, kind: output, shape index: {}]  }
   0x1   :  { %9 = vsyncpa [#allocation3 + $0x1], 0  ;;  %s479_s9 = smov 0   ;;  %s481_s10 = smov 0  }
   0x2   :  { %s483_s11 = smov 0   ;;  %s485_s12 = smov 0  }
   0x3 LB: > { %s500_s13 = sadd.s32 4294967295, %s460_s12   ;;  %s334_s14 = sadd.s32 4294967294, %s460_s12   ;;  %s460_s12 = sphi %s485_s12, %s588_s12   ;;  %s456_s11 = sphi %s483_s11, %s587_s11   ;;  %s452_s10 = sphi %s481_s10, %s586_s10   ;;  %s448_s9 = sphi %s479_s9, %s585_s9  }
   0x4   : > { %s504_s15 = sadd.s32 1, %s460_s12   ;;  %s74_s16 = sadd.s32 1, %s456_s11 }
   0x5   : > { %s71_s17 = ssub.s32 %s460_s12, %s504_s15  ;;  %p84_p0 = scmp.ne.s32.totalorder %s456_s11, %s452_s10 }
   0x6   : > { %p72_p1 = scmp.eq.s32.totalorder %s71_s17, 0  ;;  %p85_p2 = scmp.eq.s32.totalorder %s500_s13, 1 }
   0x7   : > { %p90_p3 = scmp.ne.s32.totalorder %s452_s10, %s448_s9  ;;  %p91_p4 = scmp.eq.s32.totalorder %s334_s14, 1 }
   0x8   : > { %s515_s18 = scalar_select %p72_p1, %s456_s11, %s74_s16  }
   0x9   : > { %p517_p5 = por %p85_p2, %p84_p0  ;;  %p521_p6 = por %p91_p4, %p90_p3 }
   0xa   : > { %p337_p7 = scmp.ge.s32.totalorder %s460_s12, 1  ;;  %p123_p8 = scmp.lt.s32.totalorder %s460_s12, 3 }
   0xc   : > { %p124_p9 = pnand %p337_p7, %p123_p8 }
   0xd   : > { %p147_p10 = scmp.lt.s32.totalorder (!%p124_p9), %s500_s13, 1  ;;  %s340_s29 = sshll.u32 (!%p124_p9), %s500_s13, 3 }
   0xe   : > { %127 = sbr.rel (%p124_p9) target bundleno = 513 (0x201), region = 28  ;;  %s145_s30 = sand.u32 (!%p124_p9), 1, %s452_s10  }
   0xf   : > { %s263_s5 = scalar_lea.hbm (!%p124_p9), %s582_s2, %s500_s13  ;;  %s146_s6 = scalar_lea.vmem (!%p124_p9), [#allocation2], %s145_s30 }
  0x10   : > { %s265_s7 = sshll.u32 (!%p124_p9), %s146_s6, 4  ;;  %s267_s14 = sshll.u32 (!%p124_p9), %s263_s5, 4  ;;  %s266_s7 = int_to_ptr.vmem [resolvable:$true] %s265_s7  ;;  %s268_s14 = int_to_ptr.hbm [resolvable:$true] %s267_s14 }
  0x11   : > { %s255_s17 = scalar_lea.sflag (!%p124_p9), [#allocation3], %s145_s30  ;;  %s418_s24 = scalar_lea.hbm (!%p124_p9), %s582_s2, 2 }
  0x13   : > { %v462_v0 = vmov 0   ;;  %s148_s21 = scalar_select %p147_p10, %s500_s13, 1  ;;  %vm159_vm0 = vcmask 31744   ;;  %v157_v9 = vlaneseq  ;;  %v218_v36 = vstv %s340_s29 }
  0x14   : > { %389 = vset.pattern.permute.xlu0 %v462_v0  ;;  %vm224_vm13 = vcmask 7168   ;;  %v463_v51 = vmov 0.0  }
  0x15   : > { %s338_s22 = sshll.u32 %s148_s21, 3  ;;  %v540_v10 = vand.u32 127, %v157_v9  ;;  %v217_v35 = vshrl.u32 %v157_v9, 7  ;;  %s412_s21 = sshra.s32 %s268_s14, 4  ;;  %s413_s21 = int_to_ptr.hbm [resolvable:$true] %s412_s21 }
  0x16   : > { %s150_s25 = scalar_lea.vmem %s580_s0, %s338_s22  ;;  %s154_s28 = scalar_lea.vmem %s581_s1, %s338_s22 }
  0x17   : > { %v155_v1 = vld [vmem:[%s150_s25] sm:$0xff]  ;;  %v219_v41 = vadd.s32 %v218_v36, %v217_v35  ;;  %vm248_vm14 = vcmp.eq.s32.totalorder %v540_v10, 1  ;;  %vm247_vm15 = vcmp.eq.s32.totalorder %v540_v10, 0  ;;  %s414_s13 = scalar_lea.hbm %s413_s21, 1  ;;  %p419_p0 = scmp.lt.s32.totalorder %s413_s21, %s582_s2 }
  0x18   : > { %v160_v2 = vsel %vm159_vm0, %v155_v1, -inf  ;;  %v536_v3 = vld [vmem:[%s154_s28] sm:$0xff]  ;;  %p415_p11 = scmp.ne.s32.totalorder %s413_s21, %s414_s13  ;;  %p420_p1 = scmp.lt.s32.totalorder %s418_s24, %s414_s13 }
  0x19   : > { %161 = vmax.xlane.f32.xlu0 %v160_v2  ;;  %vm220_vm9 = vcmp.ne.s32.totalorder %v536_v3, 4294967196  ;;  %vm221_vm11 = vcmp.lt.s32.totalorder %v219_v41, 16 }
  0x1a   : > { %vm222_vm12 = vmand %vm220_vm9, %vm221_vm11  ;;  %p416_p12 = pnand %p415_p11, %p517_p5  ;;  %p421_p2 = por %p420_p1, %p419_p0 }
  0x1b   : > { %v341_v52 = vsel %vm222_vm12, 1.0, %v463_v51 }
  0x1c   : > { %v237_v53 = vsel %vm224_vm13, %v341_v52, 0.0  ;;  %p417_p13 = pneg %p416_p12 }
  0x1e   : > { %p422_p3 = pnand %p421_p2, %p417_p13 }
  0x2d   : > { %164 = vperm.xlu0 %389, %v536_v3  }
  0x8c   : > { %v162_v4 = vpop.xlane.xlu0 %161 }
  0x8d   : > { %v171_v5 = vsub.f32 %v155_v1, %v162_v4 }
  0x8f   : > { %v172_v6 = vmul.f32 1.442695, %v171_v5 }
  0x91   : > { %390 = vpow2.f32 %v172_v6 }
  0x97   : > { %v391_v7 = vpop.eup %390 }
  0x98   : > { %v174_v8 = vsel %vm159_vm0, %v391_v7, 0.0 }
  0x99   : > { %175 = vadd.xlane.f32.xlu1 %v174_v8 }
  0x9f   : > { %v165_v11 = vpop.permute.xlu0 %164 }
  0xa0   : > { %vm166_vm1 = vcmp.eq.s32.totalorder %v540_v10, %v165_v11 }
  0xa1   : > { %v167_v12 = vsel %vm166_vm1, %v155_v1, 0.0 }
  0xa2   : > { %v168_v13 = vsel %vm159_vm0, %v167_v12, 0.0 }
  0xa3   : > { %169 = vadd.xlane.f32.xlu1 %v168_v13 }
 0x10c   : > { %v176_v14 = vpop.xlane.xlu1 %175 }
 0x10d   : > { %392 = vrcp.f32 %v176_v14  ;;  %v191_v23 = vand.u32 2147483648, %v176_v14  ;;  %vm185_vm3 = vweird.f32 %v176_v14  ;;  %v189_v24 = vand.u32 2147483647, %v176_v14 }
 0x10f   : > { %v192_v26 = vor.u32 1.1754944e-38, %v191_v23  ;;  %vm190_vm5 = vcmp.eq.f32.partialorder %v189_v24, 8.507059e+37 }
 0x113   : > { %v393_v15 = vpop.eup %392 }
 0x114   : > { %v181_v16 = vmul.f32 %v393_v15, %v176_v14  ;;  %vm186_vm2 = vweird.f32 %v393_v15 }
 0x115   : > { %vm187_vm4 = vmor %vm185_vm3, %vm186_vm2 }
 0x116   : > { %v182_v17 = vsub.f32 1.0, %v181_v16  ;;  %v170_v18 = vpop.xlane.xlu1 %169 }
 0x117   : > { %v177_v19 = vsub.f32 %v170_v18, %v162_v4 }
 0x118   : > { %v183_v20 = vmul.f32 %v393_v15, %v182_v17 }
 0x119   : > { %v178_v21 = vmul.f32 1.442695, %v177_v19 }
 0x11a   : > { %v184_v22 = vadd.f32 %v393_v15, %v183_v20 }
 0x11b   : > { %394 = vpow2.f32 %v178_v21 }
 0x11c   : > { %v188_v25 = vsel %vm187_vm4, %v393_v15, %v184_v22 }
 0x11d   : > { %v193_v28 = vsel %vm190_vm5, %v192_v26, %v188_v25 }
 0x121   : > { %v395_v27 = vpop.eup %394 }
 0x122   : > { %v194_v29 = vmul.f32 %v395_v27, %v193_v28 }
 0x124   : > { %v195_v30 = vsub.f32 1.0, %v194_v29 }
 0x126   : > { %v196_v31 = vmul.f32 %v195_v30, %v194_v29 }
 0x128   : > { %v198_v32 = vadd.f32 1.0, %v196_v31  ;;  %v197_v44 = vmul.f32 2.0, %v196_v31 }
 0x12a   : > { %396 = vrcp.f32 %v198_v32  ;;  %v210_v38 = vand.u32 2147483648, %v198_v32  ;;  %v208_v40 = vand.u32 2147483647, %v198_v32  ;;  %vm204_vm7 = vweird.f32 %v198_v32 }
 0x12c   : > { %v211_v43 = vor.u32 1.1754944e-38, %v210_v38  ;;  %vm209_vm10 = vcmp.eq.f32.partialorder %v208_v40, 8.507059e+37 }
 0x130   : > { %v397_v33 = vpop.eup %396 }
 0x131   : > { %v200_v34 = vmul.f32 %v397_v33, %v198_v32  ;;  %vm205_vm6 = vweird.f32 %v397_v33 }
 0x132   : > { %vm206_vm8 = vmor %vm204_vm7, %vm205_vm6 }
 0x133   : > { %v201_v37 = vsub.f32 1.0, %v200_v34 }
 0x135   : > { %v202_v39 = vmul.f32 %v397_v33, %v201_v37 }
 0x137   : > { %v203_v42 = vadd.f32 %v397_v33, %v202_v39 }
 0x139   : > { %v207_v45 = vsel %vm206_vm8, %v397_v33, %v203_v42 }
 0x13a   : > { %v212_v46 = vsel %vm209_vm10, %v211_v43, %v207_v45 }
 0x13b   : > { %v213_v47 = vmul.f32 %v212_v46, %v197_v44 }
 0x13d   : > { %v214_v48 = vsub.f32 1.0, %v213_v47 }
 0x13f   : > { %v223_v49 = vsel %vm222_vm12, %v214_v48, 0.0 }
 0x140   : > { %v225_v50 = vsel %vm224_vm13, %v223_v49, 0.0 }
 0x141   : > { %226 = vadd.xlane.f32.xlu2 %v225_v50 }
 0x149   : > { %238 = vadd.xlane.f32.xlu2 %v237_v53 }
 0x1b4   : > { %v227_v54 = vpop.xlane.xlu2 %226 }
 0x1b5   : > { %v228_v55 = vrot.slane %v227_v54, 4 }
 0x1b7   : > { %v229_v56 = vadd.f32 %v228_v55, %v227_v54 }
 0x1b9   : > { %v230_v57 = vrot.slane %v229_v56, 2 }
 0x1bb   : > { %v231_v58 = vadd.f32 %v230_v57, %v229_v56 }
 0x1bc   : > { %v239_v59 = vpop.xlane.xlu2 %238 }
 0x1bd   : > { %v240_v60 = vrot.slane %v239_v59, 4  ;;  %v232_v61 = vrot.slane %v231_v58, 1 }
 0x1bf   : > { %v241_v62 = vadd.f32 %v240_v60, %v239_v59  ;;  %v233_v63 = vadd.f32 %v232_v61, %v231_v58 }
 0x1c1   : > { %v242_v0 = vrot.slane %v241_v62, 2  ;;  %344 = vpush %v233_v63 }
 0x1c3   : > { %v243_v1 = vadd.f32 %v242_v0, %v241_v62 }
 0x1c5   : > { %v244_v2 = vrot.slane %v243_v1, 1 }
 0x1c7   : > { %v245_v3 = vadd.f32 %v244_v2, %v243_v1 }
 0x1c9   : > { %346 = vpush %v245_v3 }
 0x1f2   : > { %s345_s8 = spop %344 }
 0x1f3   : > { %v251_v5 = vstv %s345_s8 }
 0x1fa   : > { %s347_s16 = spop %346 }
 0x1fb   : > { %v249_v4 = vstv %s347_s16 }
 0x1fc   : > { %v250_v6 = vsel %vm248_vm14, %v249_v4, 0.0 }
 0x1fd   : > { %v252_v7 = vsel %vm247_vm15, %v251_v5, %v250_v6 }
 0x1fe   : > { %253 = vst [vmem:[%s146_s6] sm:$0x1] %v252_v7 }
 0x1ff   : > { %425 = shalt.err (!%p422_p3)
}
 0x200   : > { %348 = dma.vmem_to_hbm [thread:$0]  (%p517_p5), %s266_s7, 16, %s268_s14, %s255_s17  }
 0x201 PF: > { %p354_p4 = scmp.ge.s32.totalorder %s460_s12, 2  ;;  %s279_s27 = sand.u32 1, %s448_s9  }
 0x202   : > { %s280_s28 = scalar_lea.sflag [#allocation3], %s279_s27 }
 0x203   : > { %p351_p7 = pnand %p354_p4, %p521_p6 }
 0x205   : > { %p352_p8 = pneg %p351_p7 }
 0x207   : > { %443 = dma.done.wait (%p352_p8), %s280_s28, 16  }
 0x208   : > { %445 = vsyncadd (%p352_p8), %s280_s28, 4294967280  ;;  %p12_p9 = scmp.ge.s32.totalorder %s504_s15, 4   ;;  %s585_s9 = smov %s452_s10 }
 0x209   : > { %s586_s10 = smov %s456_s11  ;;  %s587_s11 = smov %s515_s18 }
 0x20a   : > { %s588_s12 = smov %s504_s15  ;;  %14 = sbr.rel (!%p12_p9) target bundleno = 3 (0x3), region = 66 }
 0x20f   :  { %285 = vsyncpa [#allocation3], 1 }
 0x210   :  { %287 = vsyncpa [#allocation3 + $0x1], 1 }

</bundles_post_ra>
